<compile_context>
chip_gen: v7x
topology: tpu7x:2x2x1
jax: 0.10.0
libtpu: 0.0.40
codegen_flags: <defaults>
</compile_context>

<pallas_src>
import math
import numpy as np

import jax
import jax.numpy as jnp
from jax.experimental import pallas as pl
from jax.experimental.pallas import tpu as pltpu


# ------------------------------------------------------------------- kernel --
def pos_encoding_kernel(x_ref, pos_ref, o_ref):
    # x_ref  : (Bblk, Tq, Dk)  current (batch-block, seq-tile) slab of x
    # pos_ref: (Tq, Dk)        matching rows of the sinusoid table
    #                          (full (Sk, Dk) table when it is VMEM-resident)
    # o_ref  : (Bblk, Tq, Dk)
    o_ref[...] = x_ref[...] + pos_ref[...][None, :, :]


# --------------------------------------------------------------- host table --
def sinusoid_encoding_table(n_position, d_hid):
    """Exact replica of the PyTorch buffer construction."""
    pos = np.arange(n_position, dtype=np.float64)[:, None]        # (P, 1)
    hid = np.arange(d_hid, dtype=np.float64)[None, :]              # (1, D)
    angle = pos / np.power(10000.0, 2.0 * (hid // 2) / d_hid)      # (P, D)
    table = np.empty((n_position, d_hid), dtype=np.float64)
    table[:, 0::2] = np.sin(angle[:, 0::2])
    table[:, 1::2] = np.cos(angle[:, 1::2])
    return jnp.asarray(table, dtype=jnp.float32)


# --------------------------------------------------------------- tile picks --
def _choose_seq_tile(S, Dk, itemsize, budget, row_align):
    """Largest tile that divides S, is row_align-aligned (or the full extent)
    and keeps one (tile, Dk) slab under `budget` bytes."""
    if S * Dk * itemsize <= budget:
        return S                              # full extent: always legal
    for t in range(S, 0, -1):
        if S % t == 0 and t % row_align == 0 and t * Dk * itemsize <= budget:
            return t
    return S                                  # fallback: full extent (legal, just big)


def _choose_batch_block(B, tq, Dk, itemsize, budget):
    per_batch = max(1, tq * Dk * itemsize)
    max_bb = max(1, budget // per_batch)
    for bb in range(min(B, max_bb), 0, -1):
        if B % bb == 0:
            return bb
    return 1


# ------------------------------------------------------------------ wrapper --
def positional_encoding(x, pos_table):
    """x: (B, S, D); pos_table: (n_position, D) with n_position >= S."""
    B, S, D = x.shape
    if pos_table.shape[0] < S:
        raise ValueError("pos_table has fewer positions than the sequence length")

    # Mem-bound kernel: stream everything in the activation dtype.
    pos = pos_table[:S].astype(x.dtype)
    itemsize = jnp.dtype(x.dtype).itemsize

    # Lane-dense last dim: fold k sequence rows into the lane axis when D is
    # not a multiple of 128. The table folds identically, so x + pos is
    # unchanged element-for-element.
    Sk, Dk = S, D
    if D % 128 != 0:
        k = math.lcm(D, 128) // D
        if S % k == 0:
            Sk, Dk = S // k, D * k
    x_k = x.reshape(B, Sk, Dk)
    pos_k = pos.reshape(Sk, Dk)

    # Sublane packing: f32 -> 8 rows, bf16 -> 16 rows, int8/fp8 -> 32 rows.
    row_align = 8 * max(1, 4 // itemsize)

    X_BLOCK_BUDGET = 2 << 20          # ~2 MiB of x per grid step
    POS_RESIDENT_BUDGET = 4 << 20     # keep whole table VMEM-resident if <= 4 MiB

    pos_bytes = Sk * Dk * itemsize
    if pos_bytes <= POS_RESIDENT_BUDGET:
        # Table fully VMEM-resident: block index constant -> DMA'd once.
        tq = Sk
        pos_spec = pl.BlockSpec((Sk, Dk), lambda s, b: (0, 0))
    else:
        # Seq tile outermost / batch innermost: the pos block index is
        # unchanged across consecutive (inner) steps, so the auto-pipeline
        # skips re-DMA of the table.
        tq = _choose_seq_tile(Sk, Dk, itemsize, X_BLOCK_BUDGET, row_align)
        pos_spec = pl.BlockSpec((tq, Dk), lambda s, b: (s, 0))

    bblk = _choose_batch_block(B, tq, Dk, itemsize, X_BLOCK_BUDGET)
    n_seq_tiles = Sk // tq
    n_batch_tiles = B // bblk

    cost = pl.CostEstimate(
        flops=B * S * D,                                  # one add per element
        transcendentals=0,
        bytes_accessed=(2 * B * S * D + S * D) * itemsize,  # table streamed once
    )

    out = pl.pallas_call(
        pos_encoding_kernel,
        out_shape=jax.ShapeDtypeStruct((B, Sk, Dk), x.dtype),
        grid=(n_seq_tiles, n_batch_tiles),
        in_specs=[
            pl.BlockSpec((bblk, tq, Dk), lambda s, b: (b, s, 0)),   # x slab
            pos_spec,                                               # table rows
        ],
        out_specs=pl.BlockSpec((bblk, tq, Dk), lambda s, b: (b, s, 0)),
        compiler_params=pltpu.CompilerParams(
            # Outer (seq-tile) axis parallel for megacore sharding; inner batch
            # axis arbitrary to preserve per-core residency of the pos tile.
            dimension_semantics=("parallel", "arbitrary"),
            # Explicit limit: above v5e's 16 MiB default, below v7x's 64 MiB.
            vmem_limit_bytes=48 << 20,
        ),
        cost_estimate=cost,
    )(x_k, pos_k)
    return out.reshape(B, S, D)


# -------------------------------------------------------------- reference ----
def positional_encoding_ref(x, pos_table):
    S = x.shape[1]
    return x + pos_table[None, :S, :]


# ----------------------------------------------------------------------------
if __name__ == "__main__":
    # Primary toy shape matching the module (B=2, seq=8, d_hid=32).
    B, S, d_hid, n_position = 2, 8, 32, 200
    x = jax.random.normal(jax.random.PRNGKey(0), (B, S, d_hid), jnp.float32)
    pos_table = sinusoid_encoding_table(n_position, d_hid)

    out = jax.block_until_ready(positional_encoding(x, pos_table))
    ref = positional_encoding_ref(x, pos_table)
    assert out.shape == ref.shape, "shape mismatch"
    assert jnp.allclose(out, ref, atol=1e-6, rtol=1e-6), "output mismatch"

    # Second small, slightly awkward shape (exercises batch blocking and the
    # lane-folding path with a non-power-of-two D).
    B2, S2, D2 = 3, 24, 48
    x2 = jax.random.normal(jax.random.PRNGKey(1), (B2, S2, D2), jnp.float32)
    pos_table2 = sinusoid_encoding_table(64, D2)
    out2 = jax.block_until_ready(positional_encoding(x2, pos_table2))
    ref2 = positional_encoding_ref(x2, pos_table2)
    assert jnp.allclose(out2, ref2, atol=1e-6, rtol=1e-6), "output mismatch (case 2)"

    print("KERNEL_OK")
</pallas_src>

<mosaic_0001>
module attributes {stable_mosaic.version = 11 : i64} {
  func.func @pos_encoding_kernel(%arg0: i32, %arg1: i32, %arg2: memref<2x2x128xf32, #tpu.memory_space<vmem>>, %arg3: memref<2x128xf32, #tpu.memory_space<vmem>>, %arg4: memref<2x2x128xf32, #tpu.memory_space<vmem>>) attributes {dimension_semantics = [#tpu.dimension_semantics<parallel>, #tpu.dimension_semantics<arbitrary>], iteration_bounds = array<i64: 1, 1>, scalar_prefetch = 0 : i64, scratch_operands = 0 : i64, tpu.core_type = #tpu.core_type<tc>, window_params = [{transform_indices = @transform_0, window_bounds = array<i64: 2, 2, 128>}, {pipeline_mode = #tpu.pipeline_mode<synchronous>, transform_indices = @transform_1, window_bounds = array<i64: 2, 128>}, {transform_indices = @transform_2, window_bounds = array<i64: 2, 2, 128>}]} {
    %c0 = arith.constant 0 : index
    %c0_0 = arith.constant 0 : index
    %c0_1 = arith.constant 0 : index
    %0 = vector.load %arg2[%c0, %c0_0, %c0_1] : memref<2x2x128xf32, #tpu.memory_space<vmem>>, vector<2x2x128xf32>
    %c0_2 = arith.constant 0 : index
    %c0_3 = arith.constant 0 : index
    %1 = vector.load %arg3[%c0_2, %c0_3] : memref<2x128xf32, #tpu.memory_space<vmem>>, vector<2x128xf32>
    %2 = vector.shape_cast %1 : vector<2x128xf32> to vector<1x2x128xf32>
    %3 = vector.broadcast %2 : vector<1x2x128xf32> to vector<2x2x128xf32>
    %4 = arith.addf %0, %3 : vector<2x2x128xf32>
    %c0_4 = arith.constant 0 : index
    %c0_5 = arith.constant 0 : index
    %c0_6 = arith.constant 0 : index
    %5 = vector.load %arg4[%c0_4, %c0_5, %c0_6] : memref<2x2x128xf32, #tpu.memory_space<vmem>>, vector<2x2x128xf32>
    tpu.vector_store %arg4[%c0_4, %c0_5, %c0_6], %4 {strides = array<i32>} : memref<2x2x128xf32, #tpu.memory_space<vmem>>, vector<2x2x128xf32>,
    return
  }
  func.func @transform_0(%arg0: i32, %arg1: i32) -> (i32, i32, i32) {
    %c0_i32 = arith.constant 0 : i32
    %c0_i32_0 = arith.constant 0 : i32
    return %arg1, %arg0, %c0_i32 : i32, i32, i32
  }
  func.func @transform_1(%arg0: i32, %arg1: i32) -> (i32, i32) {
    %c0_i32 = arith.constant 0 : i32
    %c0_i32_0 = arith.constant 0 : i32
    %c0_i32_1 = arith.constant 0 : i32
    return %c0_i32, %c0_i32_0 : i32, i32
  }
  func.func @transform_2(%arg0: i32, %arg1: i32) -> (i32, i32, i32) {
    %c0_i32 = arith.constant 0 : i32
    %c0_i32_0 = arith.constant 0 : i32
    return %arg1, %arg0, %c0_i32 : i32, i32, i32
  }
}

</mosaic_0001>

<bundles_post_ra>
// kernel: tpu_custom_call.1
= control target key start
LH: loop header
LB: loop body
LE: loop exit
PB: predicated region body
PF: predicated region fallthrough
CT: control target
= control target key end

     0   :  { %7 = vsyncpa [#allocation3], 0  ;;  %s154_s0 = inlined_call_operand.hbm [shape: f32[2,2,128], index: 0, kind: input, shape index: {}]   ;;  %s155_s1 = inlined_call_operand.vmem [shape: f32[2,128], index: 1, kind: input, shape index: {}]   ;;  %s156_s2 = inlined_call_operand.hbm [shape: f32[2,2,128], index: 2, kind: output, shape index: {}]  }
   0x1   :  { %8 = vsyncpa [#allocation4], 0  ;;  %s102_s9 = smov [#allocation2]   ;;  %s54_s13 = scalar_lea.hbm %s154_s0, 64 }
   0x2   :  { %s14_s10 = sshll.u32 %s102_s9, 4  ;;  %p55_p0 = scmp.ne.s32.totalorder %s154_s0, %s54_s13  ;;  %s15_s10 = int_to_ptr.vmem [resolvable:$true] %s14_s10 }
   0x3   :  { %p58_p1 = scmp.lt.u32.totalorder %s54_s13, %s154_s0 }
   0x5   :  { %p60_p2 = pnand %p58_p1, %p55_p0 }
   0x7   :  { %63 = shalt.err (!%p60_p2)
}
   0x8   :  { %s64_s18 = scalar_lea.vmem %s15_s10, 64  ;;  %p69_p4 = scmp.lt.s32.totalorder %s15_s10, %s15_s10 }
   0x9   :  { %p65_p3 = scmp.ne.s32.totalorder %s15_s10, %s64_s18  ;;  %p70_p5 = scmp.lt.s32.totalorder %s64_s18, %s64_s18 }
   0xb   :  { %p71_p6 = por %p70_p5, %p69_p4 }
   0xd   :  { %p72_p7 = pnand %p71_p6, %p65_p3 }
   0xf   :  { %75 = shalt.err (!%p72_p7)
}
  0x10   :  { %s103_s19 = smov 32   ;;  %s104_s20 = smov 2  }
  0x11   :  { %20 = dma.hbm_to_vmem [thread:$0]  %s154_s0, 64, %s15_s10, [#allocation3], %s103_s19, %s103_s19, %s104_s20  }
  0x12   :  { %98 = dma.done.wait [#allocation3], 64  }
  0x13   :  { %99 = vsyncadd [#allocation3], 4294967232  ;;  %s105_s23 = smov [#allocation5]   ;;  %v26_v0 = vld [vmem:[#allocation2] sm:$0x3] }
  0x14   :  { %s38_s24 = sshll.u32 %s105_s23, 4  ;;  %v28_v1 = vld [vmem:[%s155_s1] sm:$0x3]  ;;  %v27_v2 = vld [vmem:[#allocation2 + $0x2] sm:$0x3]  ;;  %s39_s24 = int_to_ptr.vmem [resolvable:$true] %s38_s24 }
  0x15   :  { %v29_v3 = vadd.f32 %v28_v1, %v26_v0  ;;  %v30_v4 = vadd.f32 %v28_v1, %v27_v2  ;;  %s76_s27 = scalar_lea.vmem %s39_s24, 64  ;;  %p81_p9 = scmp.lt.s32.totalorder %s39_s24, %s39_s24 }
  0x16   :  { %p77_p8 = scmp.ne.s32.totalorder %s39_s24, %s76_s27  ;;  %p82_p10 = scmp.lt.s32.totalorder %s76_s27, %s76_s27 }
  0x17   :  { %31 = vst [vmem:[#allocation5] sm:$0x3] %v29_v3  ;;  %32 = vst [vmem:[#allocation5 + $0x2] sm:$0x3] %v30_v4 }
  0x18   :  { %p83_p11 = por %p82_p10, %p81_p9 }
  0x1a   :  { %p84_p12 = pnand %p83_p11, %p77_p8 }
  0x1c   :  { %87 = shalt.err (!%p84_p12)
}
  0x1d   :  { %s88_s29 = scalar_lea.hbm %s156_s2, 64 }
  0x1e   :  { %p89_p13 = scmp.ne.s32.totalorder %s156_s2, %s88_s29  ;;  %p92_p0 = scmp.lt.u32.totalorder %s88_s29, %s156_s2 }
  0x20   :  { %p94_p1 = pnand %p92_p0, %p89_p13 }
  0x22   :  { %97 = shalt.err (!%p94_p1)
}
  0x23   :  { %44 = dma.vmem_to_hbm [thread:$0]  %s39_s24, 64, %s156_s2, [#allocation4], %s103_s19, %s103_s19, %s104_s20  }
  0x24   :  { %100 = dma.done.wait [#allocation4], 64  }
  0x25   :  { %101 = vsyncadd [#allocation4], 4294967232 }
  0x26   :  { %48 = vsyncpa [#allocation3], 1 }
  0x27   :  { %49 = vsyncpa [#allocation4], 1 }

</bundles_post_ra>
